<compile_context>
chip_gen: v6e
topology: v6e:2x2x1
jax: 0.10.0
libtpu: 0.0.40
codegen_flags: <defaults>
</compile_context>

<pallas_src>
import functools

import jax
import jax.numpy as jnp
from jax.experimental import pallas as pl
from jax.experimental.pallas import tpu as pltpu


def _round_up(x, m):
    return (x + m - 1) // m * m


def _cnn_layer_kernel(xf_ref, cols_ref, w_ref, b_ref, o_ref, *, TB, mxu_dtype):
    # xf_ref:   (TB, C*H*W)   lane-dense flat input (for the per-sample L2 norm)
    # cols_ref: (TB, Kp, Np)  im2col patches, zero-padded to (Kp, Np)
    # w_ref:    (OC, Kp)      flattened conv weight, zero-padded along Kp
    # b_ref:    (OC, 1)       bias
    # o_ref:    (TB, OC, Np)  lane-dense output block
    xf = xf_ref[...].astype(jnp.float32)
    ss = jnp.sum(xf * xf, axis=-1, keepdims=True)           # (TB, 1), XLU reduce
    scale = 1.0 / (jnp.sqrt(ss) + 1e-4)                     # exact, matches torch ref

    wf = w_ref[...].astype(jnp.float32)                     # (OC, Kp)
    bias = b_ref[...].astype(jnp.float32)                   # (OC, 1)

    # Static unroll over the (small) per-block batch: one MXU matmul per sample.
    for b in range(TB):
        # Fold the per-sample L2 scale into the (small) weight tile.
        wb = (wf * scale[b:b + 1, :]).astype(mxu_dtype)      # (OC, Kp)
        patches = cols_ref[b].astype(mxu_dtype)              # (Kp, Np)
        acc = jnp.dot(wb, patches,
                      preferred_element_type=jnp.float32)    # (OC, Np), f32 accum
        y = acc + bias                                       # broadcast bias add
        o_ref[b] = jnp.maximum(y, 0.0).astype(o_ref.dtype)   # ReLU, lane-dense store


def cnn_layer_forward(x, weight, bias, *, stride=(1, 1), mxu_dtype=jnp.float32):
    """Forward pass of CNNLayer: per-sample L2-normalize, Conv2d (VALID), ReLU."""
    B, C, H, W = x.shape
    OC, C2, KH, KW = weight.shape
    assert C == C2, "channel mismatch"
    if isinstance(stride, int):
        stride = (stride, stride)
    SH, SW = stride
    OH = (H - KH) // SH + 1
    OW = (W - KW) // SW + 1

    Kc = C * KH * KW
    Kp = _round_up(Kc, 8)            # sublane-aligned contraction dim
    Ncols = OH * OW
    Np = _round_up(Ncols, 128)       # lane-dense column dim

    if B <= 8:
        TB, B_pad = B, B             # one grid step for tiny batches
    else:
        TB = 8
        B_pad = _round_up(B, TB)

    # ---- wrapper-side layout plumbing: im2col, flatten, zero-pad ----
    taps = []
    for kh in range(KH):
        for kw in range(KW):
            taps.append(x[:, :, kh:kh + (OH - 1) * SH + 1:SH,
                             kw:kw + (OW - 1) * SW + 1:SW])      # (B, C, OH, OW)
    cols = jnp.stack(taps, axis=2).reshape(B, Kc, Ncols)          # (c, kh, kw) order
    cols = jnp.pad(cols, ((0, B_pad - B), (0, Kp - Kc), (0, Np - Ncols)))

    xf = jnp.pad(x.reshape(B, C * H * W), ((0, B_pad - B), (0, 0)))
    wf = jnp.pad(weight.reshape(OC, Kc), ((0, 0), (0, Kp - Kc)))  # (OC, Kp)
    bf = bias.reshape(OC, 1)

    kernel = functools.partial(_cnn_layer_kernel, TB=TB, mxu_dtype=mxu_dtype)

    out = pl.pallas_call(
        kernel,
        out_shape=jax.ShapeDtypeStruct((B_pad, OC, Np), x.dtype),
        grid_spec=pltpu.PrefetchScalarGridSpec(
            num_scalar_prefetch=0,
            grid=(B_pad // TB,),
            in_specs=[
                pl.BlockSpec((TB, C * H * W), lambda b: (b, 0)),
                pl.BlockSpec((TB, Kp, Np), lambda b: (b, 0, 0)),
                pl.BlockSpec((OC, Kp), lambda b: (0, 0)),
                pl.BlockSpec((OC, 1), lambda b: (0, 0)),
            ],
            out_specs=pl.BlockSpec((TB, OC, Np), lambda b: (b, 0, 0)),
        ),
        compiler_params=pltpu.CompilerParams(
            dimension_semantics=("parallel",)),
    )(xf, cols, wf, bf)

    # Un-pad and un-flatten to NCHW (pure wrapper-side slice/reshape).
    return out[:B, :, :Ncols].reshape(B, OC, OH, OW)


def _reference_forward(x, weight, bias, *, stride=(1, 1)):
    """Plain-JAX reference mirroring the PyTorch forward (for validation)."""
    if isinstance(stride, int):
        stride = (stride, stride)
    B = x.shape[0]
    flat = x.reshape(B, -1)
    norm = jnp.sqrt(jnp.sum(flat * flat, axis=1, keepdims=True))
    x_dir = (flat / (norm + 1e-4)).reshape(x.shape)
    y = jax.lax.conv_general_dilated(
        x_dir, weight, window_strides=stride, padding="VALID",
        dimension_numbers=("NCHW", "OIHW", "NCHW"))
    y = y + bias[None, :, None, None]
    return jnp.maximum(y, 0.0)


if __name__ == "__main__":
    # Small shapes consistent with the module: batch=2, in_channels=4,
    # spatial=16x16, out_channels=8, kernel_size=3, stride=1.
    B, C, H, W = 2, 4, 16, 16
    OC, K, stride = 8, 3, (1, 1)

    key = jax.random.PRNGKey(0)
    kx, kw, kb = jax.random.split(key, 3)

    x = jax.random.normal(kx, (B, C, H, W), dtype=jnp.float32)

    # Deterministic init matching nn.Conv2d's default: U(-k, k), k = 1/sqrt(fan_in)
    fan_in = C * K * K
    bound = 1.0 / jnp.sqrt(jnp.float32(fan_in))
    weight = jax.random.uniform(kw, (OC, C, K, K), jnp.float32, -bound, bound)
    bias = jax.random.uniform(kb, (OC,), jnp.float32, -bound, bound)

    out = cnn_layer_forward(x, weight, bias, stride=stride)
    out = jax.block_until_ready(out)

    ref = _reference_forward(x, weight, bias, stride=stride)
    assert out.shape == (B, OC, H - K + 1, W - K + 1)
    assert jnp.allclose(out, ref, atol=1e-4, rtol=1e-4), (
        f"max abs err = {jnp.max(jnp.abs(out - ref))}")

    print("KERNEL_OK")
</pallas_src>

<mosaic_0001>
module attributes {stable_mosaic.version = 11 : i64} {
  func.func @_cnn_layer_kernel(%arg0: i32, %arg1: memref<2x1024xf32, #tpu.memory_space<vmem>>, %arg2: memref<2x40x256xf32, #tpu.memory_space<vmem>>, %arg3: memref<8x40xf32, #tpu.memory_space<vmem>>, %arg4: memref<8x1xf32, #tpu.memory_space<vmem>>, %arg5: memref<2x8x256xf32, #tpu.memory_space<vmem>>) attributes {dimension_semantics = [#tpu.dimension_semantics<parallel>], iteration_bounds = array<i64: 1>, scalar_prefetch = 0 : i64, scratch_operands = 0 : i64, tpu.core_type = #tpu.core_type<tc>, window_params = [{transform_indices = @transform_0, window_bounds = array<i64: 2, 1024>}, {transform_indices = @transform_1, window_bounds = array<i64: 2, 40, 256>}, {pipeline_mode = #tpu.pipeline_mode<synchronous>, transform_indices = @transform_2, window_bounds = array<i64: 8, 40>}, {pipeline_mode = #tpu.pipeline_mode<synchronous>, transform_indices = @transform_3, window_bounds = array<i64: 8, 1>}, {transform_indices = @transform_4, window_bounds = array<i64: 2, 8, 256>}]} {
    %c0 = arith.constant 0 : index
    %c0_0 = arith.constant 0 : index
    %0 = vector.load %arg1[%c0, %c0_0] : memref<2x1024xf32, #tpu.memory_space<vmem>>, vector<2x1024xf32>
    %1 = arith.mulf %0, %0 : vector<2x1024xf32>
    %cst = arith.constant dense<0.000000e+00> : vector<2xf32>
    %2 = vector.multi_reduction <add>, %1, %cst [1] : vector<2x1024xf32> to vector<2xf32>
    %3 = vector.shape_cast %2 : vector<2xf32> to vector<2x1xf32>
    %4 = math.sqrt %3 : vector<2x1xf32>
    %cst_1 = arith.constant 9.99999974E-5 : f32
    %5 = vector.broadcast %cst_1 : f32 to vector<2x1xf32>
    %6 = arith.addf %4, %5 : vector<2x1xf32>
    %cst_2 = arith.constant 1.000000e+00 : f32
    %7 = vector.broadcast %cst_2 : f32 to vector<2x1xf32>
    %8 = arith.divf %7, %6 : vector<2x1xf32>
    %c0_3 = arith.constant 0 : index
    %c0_4 = arith.constant 0 : index
    %9 = vector.load %arg3[%c0_3, %c0_4] : memref<8x40xf32, #tpu.memory_space<vmem>>, vector<8x40xf32>
    %c0_5 = arith.constant 0 : index
    %c0_6 = arith.constant 0 : index
    %10 = vector.load %arg4[%c0_5, %c0_6] : memref<8x1xf32, #tpu.memory_space<vmem>>, vector<8x1xf32>
    %11 = vector.extract_strided_slice %8 {offsets = [0, 0], sizes = [1, 1], strides = [1, 1]} : vector<2x1xf32> to vector<1x1xf32>
    %12 = vector.broadcast %11 : vector<1x1xf32> to vector<8x40xf32>
    %13 = arith.mulf %9, %12 : vector<8x40xf32>
    %c0_7 = arith.constant 0 : index
    %c0_8 = arith.constant 0 : index
    %c0_9 = arith.constant 0 : index
    %14 = vector.load %arg2[%c0_7, %c0_8, %c0_9] : memref<2x40x256xf32, #tpu.memory_space<vmem>>, vector<1x40x256xf32>
    %15 = vector.shape_cast %14 : vector<1x40x256xf32> to vector<40x256xf32>
    %cst_10 = arith.constant dense<0.000000e+00> : vector<8x256xf32>
    %16 = tpu.matmul %13, %15, %cst_10 {dimension_numbers = #tpu.dot_dimension_numbers<[1], [0], [0], [1], [0, 0, 1, 1], [], []>} : vector<8x40xf32>, vector<40x256xf32>, vector<8x256xf32> -> vector<8x256xf32>
    %17 = vector.broadcast %10 : vector<8x1xf32> to vector<8x256xf32>
    %18 = arith.addf %16, %17 : vector<8x256xf32>
    %cst_11 = arith.constant 0.000000e+00 : f32
    %19 = vector.broadcast %cst_11 : f32 to vector<8x256xf32>
    %20 = arith.maximumf %18, %19 : vector<8x256xf32>
    %c0_12 = arith.constant 0 : index
    %c0_13 = arith.constant 0 : index
    %c0_14 = arith.constant 0 : index
    %21 = vector.load %arg5[%c0_12, %c0_13, %c0_14] : memref<2x8x256xf32, #tpu.memory_space<vmem>>, vector<1x8x256xf32>
    %22 = vector.shape_cast %21 : vector<1x8x256xf32> to vector<8x256xf32>
    %23 = vector.shape_cast %20 : vector<8x256xf32> to vector<1x8x256xf32>
    tpu.vector_store %arg5[%c0_12, %c0_13, %c0_14], %23 {strides = array<i32>} : memref<2x8x256xf32, #tpu.memory_space<vmem>>, vector<1x8x256xf32>,
    %24 = vector.extract_strided_slice %8 {offsets = [1, 0], sizes = [1, 1], strides = [1, 1]} : vector<2x1xf32> to vector<1x1xf32>
    %25 = vector.broadcast %24 : vector<1x1xf32> to vector<8x40xf32>
    %26 = arith.mulf %9, %25 : vector<8x40xf32>
    %c1 = arith.constant 1 : index
    %c0_15 = arith.constant 0 : index
    %c0_16 = arith.constant 0 : index
    %27 = vector.load %arg2[%c1, %c0_15, %c0_16] : memref<2x40x256xf32, #tpu.memory_space<vmem>>, vector<1x40x256xf32>
    %28 = vector.shape_cast %27 : vector<1x40x256xf32> to vector<40x256xf32>
    %cst_17 = arith.constant dense<0.000000e+00> : vector<8x256xf32>
    %29 = tpu.matmul %26, %28, %cst_17 {dimension_numbers = #tpu.dot_dimension_numbers<[1], [0], [0], [1], [0, 0, 1, 1], [], []>} : vector<8x40xf32>, vector<40x256xf32>, vector<8x256xf32> -> vector<8x256xf32>
    %30 = vector.broadcast %10 : vector<8x1xf32> to vector<8x256xf32>
    %31 = arith.addf %29, %30 : vector<8x256xf32>
    %cst_18 = arith.constant 0.000000e+00 : f32
    %32 = vector.broadcast %cst_18 : f32 to vector<8x256xf32>
    %33 = arith.maximumf %31, %32 : vector<8x256xf32>
    %c1_19 = arith.constant 1 : index
    %c0_20 = arith.constant 0 : index
    %c0_21 = arith.constant 0 : index
    %34 = vector.load %arg5[%c1_19, %c0_20, %c0_21] : memref<2x8x256xf32, #tpu.memory_space<vmem>>, vector<1x8x256xf32>
    %35 = vector.shape_cast %34 : vector<1x8x256xf32> to vector<8x256xf32>
    %36 = vector.shape_cast %33 : vector<8x256xf32> to vector<1x8x256xf32>
    tpu.vector_store %arg5[%c1_19, %c0_20, %c0_21], %36 {strides = array<i32>} : memref<2x8x256xf32, #tpu.memory_space<vmem>>, vector<1x8x256xf32>,
    return
  }
  func.func @transform_0(%arg0: i32) -> (i32, i32) {
    %c0_i32 = arith.constant 0 : i32
    %c0_i32_0 = arith.constant 0 : i32
    return %arg0, %c0_i32 : i32, i32
  }
  func.func @transform_1(%arg0: i32) -> (i32, i32, i32) {
    %c0_i32 = arith.constant 0 : i32
    %c0_i32_0 = arith.constant 0 : i32
    %c0_i32_1 = arith.constant 0 : i32
    return %arg0, %c0_i32, %c0_i32_0 : i32, i32, i32
  }
  func.func @transform_2(%arg0: i32) -> (i32, i32) {
    %c0_i32 = arith.constant 0 : i32
    %c0_i32_0 = arith.constant 0 : i32
    %c0_i32_1 = arith.constant 0 : i32
    return %c0_i32, %c0_i32_0 : i32, i32
  }
  func.func @transform_3(%arg0: i32) -> (i32, i32) {
    %c0_i32 = arith.constant 0 : i32
    %c0_i32_0 = arith.constant 0 : i32
    %c0_i32_1 = arith.constant 0 : i32
    return %c0_i32, %c0_i32_0 : i32, i32
  }
  func.func @transform_4(%arg0: i32) -> (i32, i32, i32) {
    %c0_i32 = arith.constant 0 : i32
    %c0_i32_0 = arith.constant 0 : i32
    %c0_i32_1 = arith.constant 0 : i32
    return %arg0, %c0_i32, %c0_i32_0 : i32, i32, i32
  }
}

</mosaic_0001>

<bundles_post_ra>
// kernel: tpu_custom_call.1
= control target key start
LH: loop header
LB: loop body
LE: loop exit
PB: predicated region body
PF: predicated region fallthrough
CT: control target
= control target key end

     0   :  { %9 = vsyncpa [#allocation3], 0  ;;  %s482_s0 = inlined_call_operand.hbm [shape: f32[2,1024], index: 0, kind: input, shape index: {}]   ;;  %s483_s1 = inlined_call_operand.hbm [shape: f32[2,40,256], index: 1, kind: input, shape index: {}]   ;;  %s484_s2 = inlined_call_operand.vmem [shape: f32[8,40], index: 2, kind: input, shape index: {}]   ;;  %s485_s3 = inlined_call_operand.vmem [shape: f32[8,1], index: 3, kind: input, shape index: {}]   ;;  %s486_s4 = inlined_call_operand.hbm [shape: f32[2,8,256], index: 4, kind: output, shape index: {}]  }
   0x1   :  { %10 = vsyncpa [#allocation6], 0 }
   0x2   :  { %11 = vsyncpa [#allocation4], 0  ;;  %s415_s15 = smov [#allocation2]   ;;  %s416_s17 = smov [#allocation5]  }
   0x3   :  { %s18_s16 = sshll.u32 %s415_s15, 4  ;;  %s27_s18 = sshll.u32 %s416_s17, 4  ;;  %s19_s16 = int_to_ptr.vmem [resolvable:$true] %s18_s16  ;;  %s28_s18 = int_to_ptr.vmem [resolvable:$true] %s27_s18 }
   0x4   :  { %s357_s19 = scalar_lea.vmem %s19_s16, 256  ;;  %p362_p1 = scmp.lt.s32.totalorder %s19_s16, %s19_s16 }
   0x5   :  { %p358_p0 = scmp.ne.s32.totalorder %s19_s16, %s357_s19  ;;  %p363_p2 = scmp.lt.s32.totalorder %s357_s19, %s357_s19 }
   0x7   :  { %p364_p3 = por %p363_p2, %p362_p1 }
   0x9   :  { %p365_p4 = pnand %p364_p3, %p358_p0 }
   0xb   :  { %368 = shalt.err (!%p365_p4)
}
   0xc   :  { %21 = dma.hbm_to_vmem [thread:$0]  %s482_s0, 256, %s19_s16, [#allocation3]  }
   0xd   :  { %s377_s22 = scalar_lea.vmem %s28_s18, 2560  ;;  %p382_p6 = scmp.lt.s32.totalorder %s28_s18, %s28_s18 }
   0xe   :  { %p378_p5 = scmp.ne.s32.totalorder %s28_s18, %s377_s22  ;;  %p383_p7 = scmp.lt.s32.totalorder %s377_s22, %s377_s22 }
  0x10   :  { %p384_p8 = por %p383_p7, %p382_p6 }
  0x12   :  { %p385_p9 = pnand %p384_p8, %p378_p5 }
  0x14   :  { %388 = shalt.err (!%p385_p9)
}
  0x15   :  { %s417_s23 = smov 256   ;;  %s418_s24 = smov 16  }
  0x16   :  { %33 = dma.hbm_to_vmem [thread:$0]  %s483_s1, 2560, %s28_s18, [#allocation6], %s417_s23, %s417_s23, %s418_s24  }
  0x17   :  { %409 = dma.done.wait [#allocation3], 256  }
  0x18   :  { %410 = vsyncadd [#allocation3], 4294967040 }
  0x19   :  { %411 = dma.done.wait [#allocation6], 2560  }
  0x1a   :  { %412 = vsyncadd [#allocation6], 4294964736  ;;  %v54_v0 = vlaneseq  ;;  %v419_v1 = vmov 1983009808   ;;  %v44_v6 = vld [vmem:[#allocation2] sm:$0xff]  ;;  %v45_v7 = vld [vmem:[#allocation2 + $0x8] sm:$0xff] }
  0x1b   :  { %v52_v2 = vunpack.c.l.s4 %v419_v1  ;;  %v46_v8 = vmul.f32 %v44_v6, %v44_v6  ;;  %v47_v9 = vmul.f32 %v45_v7, %v45_v7  ;;  %vm92_vm0 = vcmask 1041408   ;;  %v136_v35 = vld [vmem:[#allocation5 + $0x48] sm:$0xff]  ;;  %v236_v36 = vld [vmem:[#allocation5 + $0x98] sm:$0xff]  ;;  %v135_v37 = vld [vmem:[#allocation5 + $0x40] sm:$0xff]  ;;  %s422_s28 = smov [#allocation7]  }
  0x1c   :  { %v457_v3 = vshrl.u32 %v54_v0, 7  ;;  %168 = vmatprep.subr.mxu0 %v136_v35  ;;  %262 = vmatprep.subr.mxu1 %v236_v36  ;;  %v235_v38 = vld [vmem:[#allocation5 + $0x90] sm:$0xff]  ;;  %v134_v39 = vld [vmem:[#allocation5 + $0x38] sm:$0xff]  ;;  %v234_v40 = vld [vmem:[#allocation5 + $0x88] sm:$0xff]  ;;  %v420_v55 = vmov 0.0   ;;  %v421_v57 = vmov 0  }
  0x1d   :  { %v53_v4 = vunpack.c.0.s8 %v52_v2  ;;  %v50_v10 = vcombine.high %v46_v8, %v46_v8  ;;  %v67_v14 = vcombine.high %v47_v9, %v47_v9  ;;  %169 = vmatpush1.msra.mxu0 %v135_v37  ;;  %263 = vmatpush1.msra.mxu1 %v235_v38  ;;  %v133_v41 = vld [vmem:[#allocation5 + $0x30] sm:$0xff]  ;;  %v233_v42 = vld [vmem:[#allocation5 + $0x80] sm:$0xff]  ;;  %v132_v43 = vld [vmem:[#allocation5 + $0x28] sm:$0xff]  ;;  %vm142_vm3 = vcmask 326656   ;;  %s321_s29 = sshll.u32 %s422_s28, 4  ;;  %s322_s29 = int_to_ptr.vmem [resolvable:$true] %s321_s29 }
  0x1e   :  { %170 = vmatprep.subr.mxu0 %v134_v39  ;;  %264 = vmatprep.subr.mxu1 %v234_v40  ;;  %v232_v44 = vld [vmem:[#allocation5 + $0x78] sm:$0xff]  ;;  %v131_v45 = vld [vmem:[#allocation5 + $0x20] sm:$0xff]  ;;  %v231_v46 = vld [vmem:[#allocation5 + $0x70] sm:$0xff]  ;;  %v124_v1 = vsub.s32 0, %v457_v3  ;;  %v223_v2 = vsub.s32 1, %v457_v3  ;;  %p394_p11 = scmp.lt.s32.totalorder %s322_s29, %s322_s29 }
  0x1f   :  { %v56_v5 = vsub.s32 %v53_v4, %v457_v3  ;;  %171 = vmatpush1.msra.mxu0 %v133_v41  ;;  %265 = vmatpush1.msra.mxu1 %v233_v42  ;;  %v130_v47 = vld [vmem:[#allocation5 + $0x18] sm:$0xff]  ;;  %v230_v48 = vld [vmem:[#allocation5 + $0x68] sm:$0xff]  ;;  %v129_v49 = vld [vmem:[#allocation5 + $0x10] sm:$0xff] }
  0x20   :  { %172 = vmatprep.subr.mxu0 %v132_v43  ;;  %266 = vmatprep.subr.mxu1 %v232_v44  ;;  %v229_v50 = vld [vmem:[#allocation5 + $0x60] sm:$0xff]  ;;  %v128_v51 = vld [vmem:[#allocation5 + $0x8] sm:$0xff]  ;;  %v228_v52 = vld [vmem:[#allocation5 + $0x58] sm:$0xff] }
  0x21   :  { %v57_v11 = vrot.slane %v46_v8, %v56_v5  ;;  %v64_v12 = vrot.slane %v50_v10, %v56_v5  ;;  %v74_v15 = vrot.slane %v47_v9, %v56_v5  ;;  %v81_v21 = vrot.slane %v67_v14, %v56_v5  ;;  %173 = vmatpush1.msra.mxu0 %v131_v45  ;;  %v127_v53 = vld [vmem:[#allocation5] sm:$0xff]  ;;  %v227_v54 = vld [vmem:[#allocation5 + $0x50] sm:$0xff] }
  0x22   :  { %267 = vmatpush1.msra.mxu1 %v231_v46  ;;  %174 = vmatprep.subr.mxu0 %v130_v47  ;;  %v121_v56 = vld [vmem:[%s485_s3] sm:$0xff] }
  0x23   :  { %v65_v13 = vcombine.high %v57_v11, %v57_v11  ;;  %v93_v16 = vsel %vm92_vm0, %v57_v11, 0.0  ;;  %v66_v17 = vcombine.high %v64_v12, %v64_v12  ;;  %v96_v19 = vsel %vm92_vm0, %v64_v12, 0.0  ;;  %268 = vmatprep.subr.mxu1 %v230_v48  ;;  %175 = vmatpush1.msra.mxu0 %v129_v49  ;;  %v120_v5 = vld [vmem:[%s484_s2] sm:$0xff]  ;;  %s389_s2 = scalar_lea.vmem %s322_s29, 512 }
  0x24   :  { %v82_v22 = vcombine.high %v74_v15, %v74_v15  ;;  %v100_v25 = vsel %vm92_vm0, %v74_v15, 0.0  ;;  %v83_v27 = vcombine.high %v81_v21, %v81_v21  ;;  %v104_v30 = vsel %vm92_vm0, %v81_v21, 0.0  ;;  %269 = vmatpush1.msra.mxu1 %v229_v50  ;;  %176 = vmatprep.subr.mxu0 %v128_v51  ;;  %p390_p10 = scmp.ne.s32.totalorder %s322_s29, %s389_s2  ;;  %p395_p12 = scmp.lt.s32.totalorder %s389_s2, %s389_s2 }
  0x25   :  { %v94_v18 = vsel %vm92_vm0, %v65_v13, 0.0  ;;  %v98_v23 = vsel %vm92_vm0, %v66_v17, 0.0  ;;  %270 = vmatprep.subr.mxu1 %v228_v52  ;;  %177 = vmatpush1.msra.mxu0 %v127_v53 }
  0x26   :  { %v95_v20 = vadd.f32 %v94_v18, %v93_v16  ;;  %v102_v28 = vsel %vm92_vm0, %v82_v22, 0.0  ;;  %v106_v32 = vsel %vm92_vm0, %v83_v27, 0.0  ;;  %210 = vmatprep.mubr.f32.mxu0 %v420_v55  ;;  %271 = vmatpush1.msra.mxu1 %v227_v54  ;;  %p396_p13 = por %p395_p12, %p394_p11 }
  0x27   :  { %304 = vmatprep.mubr.f32.mxu1 %v420_v55  ;;  %344 = vset.pattern.permute.xlu0 %v421_v57 }
  0x28   :  { %v97_v24 = vadd.f32 %v96_v19, %v95_v20  ;;  %p397_p0 = pnand %p396_p13, %p390_p10 }
  0x2a   :  { %v99_v26 = vadd.f32 %v98_v23, %v97_v24 }
  0x2c   :  { %v101_v29 = vadd.f32 %v100_v25, %v99_v26 }
  0x2e   :  { %v103_v31 = vadd.f32 %v102_v28, %v101_v29 }
  0x30   :  { %v105_v33 = vadd.f32 %v104_v30, %v103_v31 }
  0x32   :  { %v107_v34 = vadd.f32 %v106_v32, %v105_v33 }
  0x34   :  { %108 = vadd.xlane.f32.xlu0 %v107_v34 }
  0x4a   :  { %139 = vperm.xlu0 %344, %v121_v56  }
  0xbd   :  { %v109_v58 = vpop.xlane.xlu0 %108 }
  0xbe   :  { %345 = vrsqrt.f32 %v109_v58  ;;  %vm112_vm1 = vcmp.eq.f32.partialorder %v109_v58, inf  ;;  %v115_v61 = vand.u32 2147483648, %v109_v58  ;;  %vm114_vm2 = vcmp.eq.f32.partialorder %v109_v58, 0.0 }
  0xc5   :  { %v140_v10 = vpop.permute.xlu0 %139 }
  0xcb   :  { %v346_v59 = vpop.eup %345 }
  0xcc   :  { %v111_v60 = vmul.f32 %v346_v59, %v109_v58 }
  0xce   :  { %v113_v62 = vsel %vm112_vm1, %v109_v58, %v111_v60 }
  0xcf   :  { %v116_v63 = vsel %vm114_vm2, %v115_v61, %v113_v62 }
  0xd0   :  { %v117_v0 = vadd.f32 0.0001, %v116_v63 }
  0xd2   :  { %347 = vrcp.f32 %v117_v0 }
  0xdf   :  { %v348_v4 = vpop.eup %347 }
  0xe0   :  { %v125_v6 = vrot.slane %v348_v4, %v124_v1  ;;  %v224_v7 = vrot.slane %v348_v4, %v223_v2 }
  0xe2   :  { %v126_v8 = vmul.f32 %v125_v6, %v120_v5  ;;  %v225_v9 = vmul.f32 %v224_v7, %v120_v5 }
  0xe4   :  { %334 = vmatmul.mubr.msk.f32.vlgmr.msra.gmra.mxu0 %vm142_vm3, %v126_v8  ;;  %335 = vmatmul.mubr.msk.f32.vlgmr.msra.gmra.mxu1 %vm142_vm3, %v225_v9 }
 0x1a4   :  { %v212_v11 = vpop.f32.mrf.mxu0  ;;  %v306_v12 = vpop.f32.mrf.mxu1 }
 0x1a5   :  { %v213_v13 = vadd.f32 %v212_v11, %v140_v10  ;;  %v307_v14 = vadd.f32 %v306_v12, %v140_v10 }
 0x1a6   :  { %v214_v15 = vpop.f32.mrf.mxu0  ;;  %v308_v16 = vpop.f32.mrf.mxu1 }
 0x1a7   :  { %v217_v3 = vmax.f32 %v213_v13, 0.0  ;;  %v311_v17 = vmax.f32 %v307_v14, 0.0  ;;  %v215_v18 = vadd.f32 %v214_v15, %v140_v10  ;;  %v309_v19 = vadd.f32 %v308_v16, %v140_v10 }
 0x1a9   :  { %219 = vst [vmem:[#allocation7] sm:$0xff] %v217_v3  ;;  %314 = vst [vmem:[#allocation7 + $0x10] sm:$0xff] %v311_v17  ;;  %v218_v20 = vmax.f32 %v215_v18, 0.0  ;;  %v312_v21 = vmax.f32 %v309_v19, 0.0 }
 0x1ab   :  { %220 = vst [vmem:[#allocation7 + $0x8] sm:$0xff] %v218_v20  ;;  %315 = vst [vmem:[#allocation7 + $0x18] sm:$0xff] %v312_v21 }
 0x1ac   :  { %400 = shalt.err (!%p397_p0)
}
 0x1ad   :  { %327 = dma.vmem_to_hbm [thread:$0]  %s322_s29, 512, %s486_s4, [#allocation4], %s417_s23, %s417_s23, %s418_s24  }
 0x1ae   :  { %413 = dma.done.wait [#allocation4], 512  }
 0x1af   :  { %414 = vsyncadd [#allocation4], 4294966784 }
 0x1b0   :  { %331 = vsyncpa [#allocation3], 1 }
 0x1b1   :  { %332 = vsyncpa [#allocation6], 1 }
 0x1b2   :  { %333 = vsyncpa [#allocation4], 1 }

</bundles_post_ra>
